<compile_context>
chip_gen: v7x
topology: tpu7x:2x2x1
jax: 0.10.0
libtpu: 0.0.40
codegen_flags: <defaults>
</compile_context>

<pallas_src>
import functools

import jax
import jax.numpy as jnp
from jax import lax
from jax.experimental import pallas as pl
from jax.experimental.pallas import tpu as pltpu

_LANES = 128
# Far below any achievable logit (|s| <= 1/T).  Finite (no inf-inf NaN), and
# exp(_NEG_BIG - m) == 0 exactly for any real lane-max m, so masked entries
# never contaminate the running sum-exp even without a second `where`.
_NEG_BIG = -1.0e4


def _supcon_kernel(q_ref, k_ref, lr_ref, lc_ref, out_ref,
                   rid_ref, rlab_ref, m_ref, l_ref, sp_ref, cnt_ref,
                   *, inv_t, n_valid, tm, tk, precise):
    """One (row-tile, col-tile) step of the online SupCon reduction."""
    qi = pl.program_id(0)
    ki = pl.program_id(1)
    nchunks = tk // _LANES

    @pl.when(ki == 0)
    def _init():
        # Hoist qi-only-dependent work out of the per-ki step: global row ids
        # and row labels, lane-broadcast to the full 128-lane width, live in
        # scratch for the whole row tile.  Also reset the lane-partial
        # accumulators (128 independent online-LSE streams per row).
        rid_ref[...] = qi * tm + lax.broadcasted_iota(jnp.int32, (tm, _LANES), 0)
        rlab_ref[...] = jnp.broadcast_to(lr_ref[...], (tm, _LANES))
        m_ref[...] = jnp.full_like(m_ref, _NEG_BIG)
        l_ref[...] = jnp.zeros_like(l_ref)
        sp_ref[...] = jnp.zeros_like(sp_ref)
        cnt_ref[...] = jnp.zeros_like(cnt_ref)

    # MXU: s = (q . k^T) / T with f32 accumulation.  Features are already
    # L2-normalized in the wrapper, so there is no per-step normalization.
    if precise:
        s = lax.dot_general(q_ref[...], k_ref[...],
                            dimension_numbers=(((1,), (1,)), ((), ())),
                            preferred_element_type=jnp.float32,
                            precision=lax.Precision.HIGHEST) * inv_t
    else:
        s = lax.dot_general(q_ref[...], k_ref[...],
                            dimension_numbers=(((1,), (1,)), ((), ())),
                            preferred_element_type=jnp.float32) * inv_t

    rid = rid_ref[...]
    rlab = rlab_ref[...]

    # Per-step work is purely elementwise folds over the tk/128 lane chunks
    # (VPU + EUP); no XLU cross-lane reduction until the last column tile.
    tile_max = jnp.full((tm, _LANES), _NEG_BIG, jnp.float32)
    sp_acc = jnp.zeros((tm, _LANES), jnp.float32)
    cnt_acc = jnp.zeros((tm, _LANES), jnp.float32)
    s_masked = []
    for c in range(nchunks):
        lo = c * _LANES
        s_c = s[:, lo:lo + _LANES]
        cid = ki * tk + lo + lax.broadcasted_iota(jnp.int32, (1, _LANES), 1)
        lse_m = (rid != cid) & (cid < n_valid)             # drop self + padding
        pos_f = (lse_m & (rlab == lc_ref[:, lo:lo + _LANES])).astype(jnp.float32)
        s_m = jnp.where(lse_m, s_c, _NEG_BIG)              # single fused mask select
        tile_max = jnp.maximum(tile_max, s_m)
        sp_acc = sp_acc + pos_f * s_c
        cnt_acc = cnt_acc + pos_f
        s_masked.append(s_m)

    m_prev = m_ref[...]
    m_new = jnp.maximum(m_prev, tile_max)
    p_sum = jnp.zeros((tm, _LANES), jnp.float32)
    for s_m in s_masked:
        p_sum = p_sum + jnp.exp(s_m - m_new)   # masked entries underflow to exactly 0
    l_ref[...] = jnp.exp(m_prev - m_new) * l_ref[...] + p_sum
    m_ref[...] = m_new
    sp_ref[...] += sp_acc
    cnt_ref[...] += cnt_acc

    @pl.when(ki == pl.num_programs(1) - 1)
    def _finalize():
        # Single cross-lane (XLU) merge per row tile: combine the 128 LSE lane
        # streams, then log_prob_pos = mean_pos(s) - LSE.
        m_l = m_ref[...]
        m_row = jnp.max(m_l, axis=1, keepdims=True)                            # [tm,1]
        l_row = jnp.sum(l_ref[...] * jnp.exp(m_l - m_row), axis=1, keepdims=True)
        sp_row = jnp.sum(sp_ref[...], axis=1, keepdims=True)
        cnt_row = jnp.sum(cnt_ref[...], axis=1, keepdims=True)
        lse = m_row + jnp.log(l_row)
        mlpp = (sp_row - cnt_row * lse) / jnp.maximum(cnt_row, 1.0)
        row_ids = qi * tm + lax.broadcasted_iota(jnp.int32, (tm, 1), 0)
        # TODO(synk): rows with zero positives contribute 0 here, whereas the
        # PyTorch module divides by zero (NaN); unreachable for the two-view
        # construction but the behaviors diverge for degenerate label inputs.
        row_valid = (row_ids < n_valid) & (cnt_row > 0.0)
        tile_sum = jnp.sum(jnp.where(row_valid, -mlpp, 0.0))
        # Lane-dense 128-wide store (no width-1 masked partial stores).
        out_ref[...] = tile_sum + jnp.zeros((1, _LANES), jnp.float32)


def _round_up(x, m):
    return ((x + m - 1) // m) * m


def _cdiv(a, b):
    return -(-a // b)


def _pick_block(n, d_pad, feat_itemsize):
    """Largest of {128,256,512} that keeps >=2 row tiles (v7x megacore) and
    fits a conservative VMEM budget (streams + scratch), else 128."""
    budget = 24 * 1024 * 1024
    blk = 128
    for cand in (256, 512):
        if _cdiv(n, cand) < 2:
            break
        need = (4 * cand * d_pad * feat_itemsize     # double-buffered q + k tiles
                + 6 * cand * _LANES * 4)             # lane-partial / hoisted scratch
        if need <= budget:
            blk = cand
    return blk


def _l2_normalize(x, eps=1e-12):
    x = x.astype(jnp.float32)
    n = jnp.sqrt(jnp.sum(x * x, axis=-1, keepdims=True))
    return x / jnp.maximum(n, eps)


def supcon_loss(projection1, projection2, labels=None, temperature=0.06, *,
                block=None, precise=False):
    """SupConLoss forward.  projection1/projection2: [B, D]; labels: [B] or None.

    precise=False (default): normalized features stored in bf16, bf16 MXU
    inputs with f32 accumulation (fast path).  precise=True: f32 features and
    precision=HIGHEST dot (use only if full f32 accuracy is required)."""
    assert projection1.ndim == 2 and projection1.shape == projection2.shape
    B, D = projection1.shape
    N = 2 * B
    feat_dtype = jnp.float32 if precise else jnp.bfloat16
    itemsize = jnp.dtype(feat_dtype).itemsize

    # One-off O(N*D) normalization; the kernel never re-normalizes a tile.
    feat = jnp.concatenate(
        [_l2_normalize(projection1), _l2_normalize(projection2)], axis=0)   # [N, D]

    d_pad = _round_up(D, _LANES)
    if block is None:
        block = _pick_block(N, d_pad, itemsize)
    tm = tk = int(block)
    n_pad = _round_up(N, tm)

    feat = jnp.pad(feat, ((0, n_pad - N), (0, d_pad - D))).astype(feat_dtype)

    if labels is None:
        base = jnp.arange(B, dtype=jnp.int32)      # eye mask == "same sample id"
    else:
        base = labels.reshape(-1).astype(jnp.int32)
    lab = jnp.concatenate([base, base])                                     # [N]
    lab = jnp.pad(lab, (0, n_pad - N), constant_values=-1)   # padded cols gated by validity
    lab_row = lab.reshape(n_pad, 1)
    lab_col = lab.reshape(1, n_pad)

    n_row_tiles = n_pad // tm
    n_col_tiles = n_pad // tk

    # Raise the scoped VMEM limit when the working set needs it, but clamp to
    # 48 MiB so the request also fits v7x's 64 MiB physical VMEM.
    est = 4 * tm * d_pad * itemsize + 6 * tm * _LANES * 4 + 8 * tm * tk * 4
    vmem_limit = int(min(48 * 1024 * 1024, max(32 * 1024 * 1024, 2 * est)))

    kernel = functools.partial(
        _supcon_kernel, inv_t=float(1.0 / float(temperature)), n_valid=N,
        tm=tm, tk=tk, precise=precise)

    out = pl.pallas_call(
        kernel,
        out_shape=jax.ShapeDtypeStruct((1, n_row_tiles * _LANES), jnp.float32),
        grid_spec=pltpu.PrefetchScalarGridSpec(
            num_scalar_prefetch=0,
            grid=(n_row_tiles, n_col_tiles),
            in_specs=[
                pl.BlockSpec((tm, d_pad), lambda qi, ki: (qi, 0)),    # q row tile
                pl.BlockSpec((tk, d_pad), lambda qi, ki: (ki, 0)),    # k col tile
                pl.BlockSpec((tm, 1), lambda qi, ki: (qi, 0)),        # row labels
                pl.BlockSpec((1, tk), lambda qi, ki: (0, ki)),        # col labels
            ],
            out_specs=pl.BlockSpec((1, _LANES), lambda qi, ki: (0, qi)),
            scratch_shapes=[
                pltpu.VMEM((tm, _LANES), jnp.int32),    # hoisted row ids (lane-broadcast)
                pltpu.VMEM((tm, _LANES), jnp.int32),    # hoisted row labels (lane-broadcast)
                pltpu.VMEM((tm, _LANES), jnp.float32),  # lane-partial running max
                pltpu.VMEM((tm, _LANES), jnp.float32),  # lane-partial running sum-exp
                pltpu.VMEM((tm, _LANES), jnp.float32),  # lane-partial positive-logit sum
                pltpu.VMEM((tm, _LANES), jnp.float32),  # lane-partial positive count
            ],
        ),
        compiler_params=pltpu.CompilerParams(
            dimension_semantics=("parallel", "arbitrary"),
            vmem_limit_bytes=vmem_limit),
    )(feat, feat, lab_row, lab_col)

    partial_sums = out.reshape(n_row_tiles, _LANES)[:, 0]
    return jnp.sum(partial_sums) / jnp.float32(N)


def _supcon_loss_ref(p1, p2, labels=None, temperature=0.06, feat_dtype=None):
    """Pure-JAX reference mirroring the PyTorch module.  If feat_dtype is
    given, normalized features are rounded to that dtype first (to match the
    kernel's MXU inputs exactly) while all other math stays f32."""
    def l2norm(x):
        x = x.astype(jnp.float32)
        n = jnp.sqrt(jnp.sum(x * x, axis=-1, keepdims=True))
        return x / jnp.maximum(n, 1e-12)

    B = p1.shape[0]
    feat = jnp.concatenate([l2norm(p1), l2norm(p2)], axis=0)
    if feat_dtype is not None:
        feat = feat.astype(feat_dtype).astype(jnp.float32)
    adc = jnp.dot(feat, feat.T, precision=lax.Precision.HIGHEST) / temperature
    logits = adc - jnp.max(adc, axis=1, keepdims=True)
    if labels is None:
        base = jnp.eye(B, dtype=jnp.float32)
    else:
        lab = labels.reshape(-1, 1)
        base = (lab == lab.T).astype(jnp.float32)
    mask = jnp.tile(base, (2, 2))
    n = 2 * B
    logits_mask = 1.0 - jnp.eye(n, dtype=jnp.float32)
    mask = mask * logits_mask
    exp_logits = jnp.exp(logits) * logits_mask
    log_prob = logits - jnp.log(jnp.sum(exp_logits, axis=1, keepdims=True))
    mlpp = jnp.sum(mask * log_prob, axis=1) / jnp.sum(mask, axis=1)
    return jnp.mean(-mlpp)


if __name__ == "__main__":
    key = jax.random.PRNGKey(0)
    k1, k2, k3, k4, k5, k6 = jax.random.split(key, 6)

    # Case 1: tiny single-tile grid (B=8, D=32), unsupervised and supervised.
    p1 = jax.random.normal(k1, (8, 32), dtype=jnp.float32)
    p2 = jax.random.normal(k2, (8, 32), dtype=jnp.float32)
    lab1 = jax.random.randint(k3, (8,), 0, 3)

    # Case 2: multi row/col tiles, D not a multiple of 128, padded N (N=192 ->
    # 2x2 grid of 128-tiles) -- exercises the online-LSE merge and padding masks.
    q1 = jax.random.normal(k4, (96, 200), dtype=jnp.float32)
    q2 = jax.random.normal(k5, (96, 200), dtype=jnp.float32)
    lab2 = jax.random.randint(k6, (96,), 0, 5)

    cases = [(p1, p2, None), (p1, p2, lab1), (q1, q2, None), (q1, q2, lab2)]
    for (a, b, lab) in cases:
        got = jax.block_until_ready(supcon_loss(a, b, lab, temperature=0.06))
        # Tight check: reference with identical bf16-rounded MXU inputs but
        # exact f32 math everywhere else (validates the kernel algorithm).
        ref_match = _supcon_loss_ref(a, b, lab, 0.06, feat_dtype=jnp.bfloat16)
        assert jnp.isfinite(got)
        assert jnp.allclose(got, ref_match, atol=5e-4, rtol=5e-4), (got, ref_match)
        # End-to-end sanity vs the pure-f32 reference (only difference is the
        # bf16 rounding of the MXU inputs).
        ref_f32 = _supcon_loss_ref(a, b, lab, 0.06)
        assert jnp.allclose(got, ref_f32, atol=6e-2, rtol=2e-2), (got, ref_f32)

    print("KERNEL_OK")
</pallas_src>

<mosaic_0001>
module attributes {stable_mosaic.version = 11 : i64} {
  func.func @_supcon_kernel(%arg0: i32, %arg1: i32, %arg2: memref<128x128xbf16, #tpu.memory_space<vmem>>, %arg3: memref<128x128xbf16, #tpu.memory_space<vmem>>, %arg4: memref<128x1xi32, #tpu.memory_space<vmem>>, %arg5: memref<1x128xi32, #tpu.memory_space<vmem>>, %arg6: memref<1x128xf32, #tpu.memory_space<vmem>>, %arg7: memref<128x128xi32, #tpu.memory_space<vmem>>, %arg8: memref<128x128xi32, #tpu.memory_space<vmem>>, %arg9: memref<128x128xf32, #tpu.memory_space<vmem>>, %arg10: memref<128x128xf32, #tpu.memory_space<vmem>>, %arg11: memref<128x128xf32, #tpu.memory_space<vmem>>, %arg12: memref<128x128xf32, #tpu.memory_space<vmem>>) attributes {dimension_semantics = [#tpu.dimension_semantics<parallel>, #tpu.dimension_semantics<arbitrary>], iteration_bounds = array<i64: 1, 1>, scalar_prefetch = 0 : i64, scratch_operands = 6 : i64, tpu.core_type = #tpu.core_type<tc>, window_params = [{transform_indices = @transform_0, window_bounds = array<i64: 128, 128>}, {transform_indices = @transform_1, window_bounds = array<i64: 128, 128>}, {transform_indices = @transform_2, window_bounds = array<i64: 128, 1>}, {transform_indices = @transform_3, window_bounds = array<i64: 1, 128>}, {transform_indices = @transform_4, window_bounds = array<i64: 1, 128>}]} {
    %c0_i32 = arith.constant 0 : i32
    %0 = arith.cmpi eq, %arg1, %c0_i32 : i32
    %1 = arith.extui %0 : i1 to i32
    %c0_i32_0 = arith.constant 0 : i32
    %2 = arith.cmpi ne, %1, %c0_i32_0 : i32
    scf.if %2 {
      %c128_i32_35 = arith.constant 128 : i32
      %58 = arith.muli %arg0, %c128_i32_35 : i32
      %59 = tpu.iota {dimensions = array<i32: 0>} : vector<128x128xi32>
      %60 = vector.broadcast %58 : i32 to vector<128x128xi32>
      %61 = arith.addi %60, %59 : vector<128x128xi32>
      %c0_36 = arith.constant 0 : index
      %c0_37 = arith.constant 0 : index
      %62 = vector.load %arg7[%c0_36, %c0_37] : memref<128x128xi32, #tpu.memory_space<vmem>>, vector<128x128xi32>
      tpu.vector_store %arg7[%c0_36, %c0_37], %61 {strides = array<i32>} : memref<128x128xi32, #tpu.memory_space<vmem>>, vector<128x128xi32>,
      %c0_38 = arith.constant 0 : index
      %c0_39 = arith.constant 0 : index
      %63 = vector.load %arg4[%c0_38, %c0_39] : memref<128x1xi32, #tpu.memory_space<vmem>>, vector<128x1xi32>
      %64 = vector.shape_cast %63 : vector<128x1xi32> to vector<128x1xi32>
      %65 = vector.broadcast %64 : vector<128x1xi32> to vector<128x128xi32>
      %c0_40 = arith.constant 0 : index
      %c0_41 = arith.constant 0 : index
      %66 = vector.load %arg8[%c0_40, %c0_41] : memref<128x128xi32, #tpu.memory_space<vmem>>, vector<128x128xi32>
      tpu.vector_store %arg8[%c0_40, %c0_41], %65 {strides = array<i32>} : memref<128x128xi32, #tpu.memory_space<vmem>>, vector<128x128xi32>,
      %cst_42 = arith.constant -1.000000e+04 : f32
      %67 = vector.broadcast %cst_42 : f32 to vector<128x128xf32>
      %c0_43 = arith.constant 0 : index
      %c0_44 = arith.constant 0 : index
      %68 = vector.load %arg9[%c0_43, %c0_44] : memref<128x128xf32, #tpu.memory_space<vmem>>, vector<128x128xf32>
      tpu.vector_store %arg9[%c0_43, %c0_44], %67 {strides = array<i32>} : memref<128x128xf32, #tpu.memory_space<vmem>>, vector<128x128xf32>,
      %cst_45 = arith.constant 0.000000e+00 : f32
      %69 = vector.broadcast %cst_45 : f32 to vector<128x128xf32>
      %c0_46 = arith.constant 0 : index
      %c0_47 = arith.constant 0 : index
      %70 = vector.load %arg10[%c0_46, %c0_47] : memref<128x128xf32, #tpu.memory_space<vmem>>, vector<128x128xf32>
      tpu.vector_store %arg10[%c0_46, %c0_47], %69 {strides = array<i32>} : memref<128x128xf32, #tpu.memory_space<vmem>>, vector<128x128xf32>,
      %cst_48 = arith.constant 0.000000e+00 : f32
      %71 = vector.broadcast %cst_48 : f32 to vector<128x128xf32>
      %c0_49 = arith.constant 0 : index
      %c0_50 = arith.constant 0 : index
      %72 = vector.load %arg11[%c0_49, %c0_50] : memref<128x128xf32, #tpu.memory_space<vmem>>, vector<128x128xf32>
      tpu.vector_store %arg11[%c0_49, %c0_50], %71 {strides = array<i32>} : memref<128x128xf32, #tpu.memory_space<vmem>>, vector<128x128xf32>,
      %cst_51 = arith.constant 0.000000e+00 : f32
      %73 = vector.broadcast %cst_51 : f32 to vector<128x128xf32>
      %c0_52 = arith.constant 0 : index
      %c0_53 = arith.constant 0 : index
      %74 = vector.load %arg12[%c0_52, %c0_53] : memref<128x128xf32, #tpu.memory_space<vmem>>, vector<128x128xf32>
      tpu.vector_store %arg12[%c0_52, %c0_53], %73 {strides = array<i32>} : memref<128x128xf32, #tpu.memory_space<vmem>>, vector<128x128xf32>,
    } else {
    }
    %c0 = arith.constant 0 : index
    %c0_1 = arith.constant 0 : index
    %3 = vector.load %arg2[%c0, %c0_1] : memref<128x128xbf16, #tpu.memory_space<vmem>>, vector<128x128xbf16>
    %c0_2 = arith.constant 0 : index
    %c0_3 = arith.constant 0 : index
    %4 = vector.load %arg3[%c0_2, %c0_3] : memref<128x128xbf16, #tpu.memory_space<vmem>>, vector<128x128xbf16>
    %cst = arith.constant dense<0.000000e+00> : vector<128x128xf32>
    %5 = tpu.matmul %3, %4, %cst {dimension_numbers = #tpu.dot_dimension_numbers<[1], [1], [0], [0], [0, 0, 1, 0], [], []>} : vector<128x128xbf16>, vector<128x128xbf16>, vector<128x128xf32> -> vector<128x128xf32>
    %cst_4 = arith.constant 16.666666 : f32
    %6 = vector.broadcast %cst_4 : f32 to vector<128x128xf32>
    %7 = arith.mulf %5, %6 : vector<128x128xf32>
    %c0_5 = arith.constant 0 : index
    %c0_6 = arith.constant 0 : index
    %8 = vector.load %arg7[%c0_5, %c0_6] : memref<128x128xi32, #tpu.memory_space<vmem>>, vector<128x128xi32>
    %c0_7 = arith.constant 0 : index
    %c0_8 = arith.constant 0 : index
    %9 = vector.load %arg8[%c0_7, %c0_8] : memref<128x128xi32, #tpu.memory_space<vmem>>, vector<128x128xi32>
    %cst_9 = arith.constant -1.000000e+04 : f32
    %10 = vector.broadcast %cst_9 : f32 to vector<128x128xf32>
    %cst_10 = arith.constant 0.000000e+00 : f32
    %11 = vector.broadcast %cst_10 : f32 to vector<128x128xf32>
    %cst_11 = arith.constant 0.000000e+00 : f32
    %12 = vector.broadcast %cst_11 : f32 to vector<128x128xf32>
    %c128_i32 = arith.constant 128 : i32
    %13 = arith.muli %arg1, %c128_i32 : i32
    %c0_i32_12 = arith.constant 0 : i32
    %14 = arith.addi %13, %c0_i32_12 : i32
    %15 = tpu.iota {dimensions = array<i32: 1>} : vector<1x128xi32>
    %16 = vector.broadcast %14 : i32 to vector<1x128xi32>
    %17 = arith.addi %16, %15 : vector<1x128xi32>
    %18 = vector.broadcast %17 : vector<1x128xi32> to vector<128x128xi32>
    %19 = arith.cmpi ne, %8, %18 : vector<128x128xi32>
    %c16_i32 = arith.constant 16 : i32
    %20 = vector.broadcast %c16_i32 : i32 to vector<1x128xi32>
    %21 = arith.cmpi slt, %17, %20 : vector<1x128xi32>
    %22 = vector.broadcast %21 : vector<1x128xi1> to vector<128x128xi1>
    %23 = arith.andi %19, %22 : vector<128x128xi1>
    %c0_13 = arith.constant 0 : index
    %c0_14 = arith.constant 0 : index
    %24 = vector.load %arg5[%c0_13, %c0_14] : memref<1x128xi32, #tpu.memory_space<vmem>>, vector<1x128xi32>
    %25 = vector.broadcast %24 : vector<1x128xi32> to vector<128x128xi32>
    %26 = arith.cmpi eq, %9, %25 : vector<128x128xi32>
    %27 = arith.andi %23, %26 : vector<128x128xi1>
    %28 = arith.extui %27 : vector<128x128xi1> to vector<128x128xi32>
    %29 = arith.sitofp %28 : vector<128x128xi32> to vector<128x128xf32>
    %cst_15 = arith.constant -1.000000e+04 : f32
    %30 = vector.broadcast %cst_15 : f32 to vector<128x128xf32>
    %31 = arith.select %23, %7, %30 : vector<128x128xi1>, vector<128x128xf32>
    %32 = arith.maximumf %10, %31 : vector<128x128xf32>
    %33 = arith.mulf %29, %7 : vector<128x128xf32>
    %34 = arith.addf %11, %33 : vector<128x128xf32>
    %35 = arith.addf %12, %29 : vector<128x128xf32>
    %c0_16 = arith.constant 0 : index
    %c0_17 = arith.constant 0 : index
    %36 = vector.load %arg9[%c0_16, %c0_17] : memref<128x128xf32, #tpu.memory_space<vmem>>, vector<128x128xf32>
    %37 = arith.maximumf %36, %32 : vector<128x128xf32>
    %cst_18 = arith.constant 0.000000e+00 : f32
    %38 = vector.broadcast %cst_18 : f32 to vector<128x128xf32>
    %39 = arith.subf %31, %37 : vector<128x128xf32>
    %40 = math.exp %39 : vector<128x128xf32>
    %41 = arith.addf %38, %40 : vector<128x128xf32>
    %42 = arith.subf %36, %37 : vector<128x128xf32>
    %43 = math.exp %42 : vector<128x128xf32>
    %c0_19 = arith.constant 0 : index
    %c0_20 = arith.constant 0 : index
    %44 = vector.load %arg10[%c0_19, %c0_20] : memref<128x128xf32, #tpu.memory_space<vmem>>, vector<128x128xf32>
    %45 = arith.mulf %43, %44 : vector<128x128xf32>
    %46 = arith.addf %45, %41 : vector<128x128xf32>
    %c0_21 = arith.constant 0 : index
    %c0_22 = arith.constant 0 : index
    %47 = vector.load %arg10[%c0_21, %c0_22] : memref<128x128xf32, #tpu.memory_space<vmem>>, vector<128x128xf32>
    tpu.vector_store %arg10[%c0_21, %c0_22], %46 {strides = array<i32>} : memref<128x128xf32, #tpu.memory_space<vmem>>, vector<128x128xf32>,
    %c0_23 = arith.constant 0 : index
    %c0_24 = arith.constant 0 : index
    %48 = vector.load %arg9[%c0_23, %c0_24] : memref<128x128xf32, #tpu.memory_space<vmem>>, vector<128x128xf32>
    tpu.vector_store %arg9[%c0_23, %c0_24], %37 {strides = array<i32>} : memref<128x128xf32, #tpu.memory_space<vmem>>, vector<128x128xf32>,
    %c0_25 = arith.constant 0 : index
    %c0_26 = arith.constant 0 : index
    %49 = vector.load %arg11[%c0_25, %c0_26] : memref<128x128xf32, #tpu.memory_space<vmem>>, vector<128x128xf32>
    %50 = arith.addf %49, %34 : vector<128x128xf32>
    %c0_27 = arith.constant 0 : index
    %c0_28 = arith.constant 0 : index
    %51 = vector.load %arg11[%c0_27, %c0_28] : memref<128x128xf32, #tpu.memory_space<vmem>>, vector<128x128xf32>
    tpu.vector_store %arg11[%c0_27, %c0_28], %50 {strides = array<i32>} : memref<128x128xf32, #tpu.memory_space<vmem>>, vector<128x128xf32>,
    %c0_29 = arith.constant 0 : index
    %c0_30 = arith.constant 0 : index
    %52 = vector.load %arg12[%c0_29, %c0_30] : memref<128x128xf32, #tpu.memory_space<vmem>>, vector<128x128xf32>
    %53 = arith.addf %52, %35 : vector<128x128xf32>
    %c0_31 = arith.constant 0 : index
    %c0_32 = arith.constant 0 : index
    %54 = vector.load %arg12[%c0_31, %c0_32] : memref<128x128xf32, #tpu.memory_space<vmem>>, vector<128x128xf32>
    tpu.vector_store %arg12[%c0_31, %c0_32], %53 {strides = array<i32>} : memref<128x128xf32, #tpu.memory_space<vmem>>, vector<128x128xf32>,
    %c0_i32_33 = arith.constant 0 : i32
    %55 = arith.cmpi eq, %arg1, %c0_i32_33 : i32
    %56 = arith.extui %55 : i1 to i32
    %c0_i32_34 = arith.constant 0 : i32
    %57 = arith.cmpi ne, %56, %c0_i32_34 : i32
    scf.if %57 {
      %c0_35 = arith.constant 0 : index
      %c0_36 = arith.constant 0 : index
      %58 = vector.load %arg9[%c0_35, %c0_36] : memref<128x128xf32, #tpu.memory_space<vmem>>, vector<128x128xf32>
      %cst_37 = arith.constant dense<0xFF800000> : vector<128xf32>
      %59 = vector.multi_reduction <maximumf>, %58, %cst_37 [1] : vector<128x128xf32> to vector<128xf32>
      %60 = vector.shape_cast %59 : vector<128xf32> to vector<128x1xf32>
      %c0_38 = arith.constant 0 : index
      %c0_39 = arith.constant 0 : index
      %61 = vector.load %arg10[%c0_38, %c0_39] : memref<128x128xf32, #tpu.memory_space<vmem>>, vector<128x128xf32>
      %62 = vector.broadcast %60 : vector<128x1xf32> to vector<128x128xf32>
      %63 = arith.subf %58, %62 : vector<128x128xf32>
      %64 = math.exp %63 : vector<128x128xf32>
      %65 = arith.mulf %61, %64 : vector<128x128xf32>
      %cst_40 = arith.constant dense<0.000000e+00> : vector<128xf32>
      %66 = vector.multi_reduction <add>, %65, %cst_40 [1] : vector<128x128xf32> to vector<128xf32>
      %67 = vector.shape_cast %66 : vector<128xf32> to vector<128x1xf32>
      %c0_41 = arith.constant 0 : index
      %c0_42 = arith.constant 0 : index
      %68 = vector.load %arg11[%c0_41, %c0_42] : memref<128x128xf32, #tpu.memory_space<vmem>>, vector<128x128xf32>
      %cst_43 = arith.constant dense<0.000000e+00> : vector<128xf32>
      %69 = vector.multi_reduction <add>, %68, %cst_43 [1] : vector<128x128xf32> to vector<128xf32>
      %70 = vector.shape_cast %69 : vector<128xf32> to vector<128x1xf32>
      %c0_44 = arith.constant 0 : index
      %c0_45 = arith.constant 0 : index
      %71 = vector.load %arg12[%c0_44, %c0_45] : memref<128x128xf32, #tpu.memory_space<vmem>>, vector<128x128xf32>
      %cst_46 = arith.constant dense<0.000000e+00> : vector<128xf32>
      %72 = vector.multi_reduction <add>, %71, %cst_46 [1] : vector<128x128xf32> to vector<128xf32>
      %73 = vector.shape_cast %72 : vector<128xf32> to vector<128x1xf32>
      %74 = math.log %67 : vector<128x1xf32>
      %75 = arith.addf %60, %74 : vector<128x1xf32>
      %76 = arith.mulf %73, %75 : vector<128x1xf32>
      %77 = arith.subf %70, %76 : vector<128x1xf32>
      %cst_47 = arith.constant 1.000000e+00 : f32
      %78 = vector.broadcast %cst_47 : f32 to vector<128x1xf32>
      %79 = arith.maximumf %73, %78 : vector<128x1xf32>
      %80 = arith.divf %77, %79 : vector<128x1xf32>
      %c128_i32_48 = arith.constant 128 : i32
      %81 = arith.muli %arg0, %c128_i32_48 : i32
      %82 = tpu.iota {dimensions = array<i32: 0>} : vector<128x1xi32>
      %83 = vector.broadcast %81 : i32 to vector<128x1xi32>
      %84 = arith.addi %83, %82 : vector<128x1xi32>
      %c16_i32_49 = arith.constant 16 : i32
      %85 = vector.broadcast %c16_i32_49 : i32 to vector<128x1xi32>
      %86 = arith.cmpi slt, %84, %85 : vector<128x1xi32>
      %cst_50 = arith.constant 0.000000e+00 : f32
      %87 = vector.broadcast %cst_50 : f32 to vector<128x1xf32>
      %88 = arith.cmpf ogt, %73, %87 : vector<128x1xf32>
      %89 = arith.andi %86, %88 : vector<128x1xi1>
      %cst_51 = arith.constant 0.000000e+00 : f32
      %90 = vector.broadcast %cst_51 : f32 to vector<128x1xf32>
      %91 = arith.subf %90, %80 : vector<128x1xf32>
      %cst_52 = arith.constant 0.000000e+00 : f32
      %92 = vector.broadcast %cst_52 : f32 to vector<128x1xf32>
      %93 = arith.select %89, %91, %92 : vector<128x1xi1>, vector<128x1xf32>
      %94 = vector.shape_cast %93 : vector<128x1xf32> to vector<1x128x1xf32>
      %cst_53 = arith.constant dense<0.000000e+00> : vector<1xf32>
      %95 = vector.multi_reduction <add>, %94, %cst_53 [1, 2] : vector<1x128x1xf32> to vector<1xf32>
      %96 = vector.shape_cast %95 : vector<1xf32> to vector<1x1x1xf32>
      %97 = vector.extract %96[0, 0, 0] : f32 from vector<1x1x1xf32>
      %cst_54 = arith.constant 0.000000e+00 : f32
      %98 = vector.broadcast %cst_54 : f32 to vector<1x128xf32>
      %99 = vector.broadcast %97 : f32 to vector<1x128xf32>
      %100 = arith.addf %99, %98 : vector<1x128xf32>
      %c0_55 = arith.constant 0 : index
      %c0_56 = arith.constant 0 : index
      %101 = vector.load %arg6[%c0_55, %c0_56] : memref<1x128xf32, #tpu.memory_space<vmem>>, vector<1x128xf32>
      tpu.vector_store %arg6[%c0_55, %c0_56], %100 {strides = array<i32>} : memref<1x128xf32, #tpu.memory_space<vmem>>, vector<1x128xf32>,
    } else {
    }
    return
  }
  func.func @transform_0(%arg0: i32, %arg1: i32) -> (i32, i32) {
    %c0_i32 = arith.constant 0 : i32
    %c0_i32_0 = arith.constant 0 : i32
    return %arg0, %c0_i32 : i32, i32
  }
  func.func @transform_1(%arg0: i32, %arg1: i32) -> (i32, i32) {
    %c0_i32 = arith.constant 0 : i32
    %c0_i32_0 = arith.constant 0 : i32
    return %arg1, %c0_i32 : i32, i32
  }
  func.func @transform_2(%arg0: i32, %arg1: i32) -> (i32, i32) {
    %c0_i32 = arith.constant 0 : i32
    %c0_i32_0 = arith.constant 0 : i32
    return %arg0, %c0_i32 : i32, i32
  }
  func.func @transform_3(%arg0: i32, %arg1: i32) -> (i32, i32) {
    %c0_i32 = arith.constant 0 : i32
    %c0_i32_0 = arith.constant 0 : i32
    return %c0_i32, %arg1 : i32, i32
  }
  func.func @transform_4(%arg0: i32, %arg1: i32) -> (i32, i32) {
    %c0_i32 = arith.constant 0 : i32
    %c0_i32_0 = arith.constant 0 : i32
    return %c0_i32, %arg0 : i32, i32
  }
}

</mosaic_0001>

<bundles_post_ra>
// kernel: tpu_custom_call.1
= control target key start
LH: loop header
LB: loop body
LE: loop exit
PB: predicated region body
PF: predicated region fallthrough
CT: control target
= control target key end

     0   :  { %v1724_v2 = vmov 0   ;;  %s1845_s0 = inlined_call_operand.vmem [shape: bf16[128,128], index: 0, kind: input, shape index: {}]   ;;  %s1846_s1 = inlined_call_operand.vmem [shape: bf16[128,128], index: 1, kind: input, shape index: {}]   ;;  %s1847_s2 = inlined_call_operand.vmem [shape: s32[128,1], index: 2, kind: input, shape index: {}]   ;;  %s1848_s3 = inlined_call_operand.vmem [shape: s32[1,128], index: 3, kind: input, shape index: {}]   ;;  %s1849_s4 = inlined_call_operand.hbm [shape: f32[1,128], index: 4, kind: output, shape index: {}]  }
   0x1   :  { %v1664_v0 = vld [vmem:[%s1846_s1] sm:$0xff]   ;;  %v1665_v1 = vld [vmem:[%s1846_s1 + $0x8] sm:$0xff]   ;;  %1662 = vset.pattern.permute.xlu1 %v1724_v2  ;;  %1663 = vset.pattern.permute.xlu0 %v1724_v2  ;;  %v1666_v3 = vld [vmem:[%s1846_s1 + $0x10] sm:$0xff]  }
   0x2   :  { %1609 = vmatprep.subr.bf16.mxu0 %v1664_v0  ;;  %1641 = vmatprep.subr.bf16.mxu1 %v1664_v0  ;;  %v1672_v4 = vld [vmem:[%s1845_s0] sm:$0xff]   ;;  %v75_v6 = vld [vmem:[%s1847_s2 + $0x8] sm:$0xff] }
   0x3   :  { %1610 = vmatpush3.bf16.xpose.msra.mxu0 %v1664_v0  ;;  %1649 = vmatpush3.bf16.xpose.msra.mxu1 %v1664_v0  ;;  %v74_v5 = vld [vmem:[%s1847_s2] sm:$0xff] }
   0x4   :  { %1611 = vmatprep.subr.bf16.mxu0 %v1665_v1  ;;  %1642 = vmatprep.subr.bf16.mxu1 %v1665_v1 }
   0x5   :  { %1625 = vmatprep.mubr.bf16.mxu0 %v1672_v4  ;;  %91 = vperm.xlu1 %1662, %v74_v5  }
   0x9   :  { %94 = vperm.xlu1 %1662, %v75_v6  }
   0xb   :  { %1612 = vmatpush3.bf16.xpose.msra.mxu0 %v1665_v1  ;;  %1650 = vmatpush3.bf16.xpose.msra.mxu1 %v1665_v1 }
   0xc   :  { %1613 = vmatprep.subr.bf16.mxu0 %v1666_v3  ;;  %1643 = vmatprep.subr.bf16.mxu1 %v1666_v3 }
   0xd   :  { %9 = vsyncpa [#allocation9], 0  ;;  %v1667_v7 = vld [vmem:[%s1846_s1 + $0x18] sm:$0xff]   ;;  %v1668_v8 = vld [vmem:[%s1846_s1 + $0x20] sm:$0xff]   ;;  %v24_v13 = vlaneseq  ;;  %v1725_v60 = vmov 0.0   ;;  %vm1502_vm10 = vcmask 7168  }
   0xe   :  { %v1669_v9 = vld [vmem:[%s1846_s1 + $0x28] sm:$0xff]   ;;  %v1670_v10 = vld [vmem:[%s1846_s1 + $0x30] sm:$0xff]   ;;  %v1671_v11 = vld [vmem:[%s1846_s1 + $0x38] sm:$0xff]  }
   0xf   :  { %v1673_v12 = vld [vmem:[%s1845_s0 + $0x8] sm:$0xff]   ;;  %v25_v14 = vshrl.u32 %v24_v13, 7  ;;  %v493_v15 = vand.u32 127, %v24_v13  ;;  %v1576_v49 = vld [vmem:[%s1848_s3] ss:$0 sm:$0xff]  ;;  %v1677_v4 = vld [vmem:[%s1845_s0 + $0x30] sm:$0xff]  }
  0x10   :  { %v1674_v1 = vld [vmem:[%s1845_s0 + $0x20] sm:$0xff]   ;;  %v1675_v2 = vld [vmem:[%s1845_s0 + $0x28] sm:$0xff]   ;;  %v1678_v5 = vld [vmem:[%s1845_s0 + $0x18] sm:$0xff]  }
  0x11   :  { %v26_v16 = vadd.s32 8, %v25_v14  ;;  %vm496_vm0 = vcmp.ne.s32.totalorder %v25_v14, %v493_v15  ;;  %vm512_vm1 = vcmp.lt.s32.totalorder %v493_v15, 16  ;;  %1633 = vmatprep.mubr.bf16.mxu1 %v1674_v1  ;;  %v1679_v6 = vld [vmem:[%s1845_s0 + $0x38] sm:$0xff]  }
  0x12   :  { %vm1788_vm3 = vmand %vm496_vm0, %vm512_vm1 }
  0x13   :  { %1614 = vmatpush3.bf16.xpose.msra.mxu0 %v1666_v3  ;;  %1651 = vmatpush3.bf16.xpose.msra.mxu1 %v1666_v3  ;;  %vm497_vm2 = vcmp.ne.s32.totalorder %v26_v16, %v493_v15  ;;  %v1676_v3 = vld [vmem:[%s1845_s0 + $0x10] sm:$0xff]   ;;  %s1726_s0 = smov [#allocation8]  }
  0x14   :  { %1615 = vmatprep.subr.bf16.mxu0 %v1667_v7  ;;  %1644 = vmatprep.subr.bf16.mxu1 %v1667_v7  ;;  %vm1794_vm4 = vmand %vm497_vm2, %vm512_vm1  ;;  %s1552_s24 = sshll.u32 %s1726_s0, 4  ;;  %s1553_s24 = int_to_ptr.vmem [resolvable:$true] %s1552_s24 }
  0x15   :  { %s1700_s26 = scalar_lea.vmem %s1553_s24, 16  ;;  %s1704_s27 = scalar_lea.vmem %s1553_s24, 32 }
  0x16   :  { %p1701_p0 = scmp.ne.s32.totalorder %s1553_s24, %s1700_s26  ;;  %p1705_p1 = scmp.lt.s32.totalorder %s1553_s24, %s1553_s24 }
  0x17   :  { %p1706_p2 = scmp.lt.s32.totalorder %s1704_s27, %s1700_s26 }
  0x19   :  { %p1707_p3 = por %p1706_p2, %p1705_p1 }
  0x1b   :  { %1616 = vmatpush3.bf16.xpose.msra.mxu0 %v1667_v7  ;;  %1652 = vmatpush3.bf16.xpose.msra.mxu1 %v1667_v7  ;;  %p1708_p4 = pnand %p1707_p3, %p1701_p0 }
  0x1c   :  { %1617 = vmatprep.subr.bf16.mxu0 %v1668_v8  ;;  %1645 = vmatprep.subr.bf16.mxu1 %v1668_v8 }
  0x23   :  { %1618 = vmatpush3.bf16.xpose.msra.mxu0 %v1668_v8  ;;  %1653 = vmatpush3.bf16.xpose.msra.mxu1 %v1668_v8 }
  0x24   :  { %1619 = vmatprep.subr.bf16.mxu0 %v1669_v9  ;;  %1646 = vmatprep.subr.bf16.mxu1 %v1669_v9 }
  0x2b   :  { %1620 = vmatpush3.bf16.xpose.msra.mxu0 %v1669_v9  ;;  %1654 = vmatpush3.bf16.xpose.msra.mxu1 %v1669_v9 }
  0x2c   :  { %1621 = vmatprep.subr.bf16.mxu0 %v1670_v10  ;;  %1647 = vmatprep.subr.bf16.mxu1 %v1670_v10 }
  0x33   :  { %1622 = vmatpush3.bf16.xpose.msra.mxu0 %v1670_v10  ;;  %1655 = vmatpush3.bf16.xpose.msra.mxu1 %v1670_v10 }
  0x34   :  { %1623 = vmatprep.subr.bf16.mxu0 %v1671_v11  ;;  %1648 = vmatprep.subr.bf16.mxu1 %v1671_v11 }
  0x3b   :  { %1624 = vmatpush3.bf16.xpose.msra.mxu0 %v1671_v11  ;;  %1656 = vmatpush3.bf16.xpose.msra.mxu1 %v1671_v11 }
  0x42   :  { %1626 = vmatmul.mubr.bf16.vlgmr.msra.gmra.mrb[0].mxu0 %v1673_v12  ;;  %1634 = vmatmul.mubr.bf16.vlgmr.msra.gmra.mrb[0].mxu1 %v1675_v2 }
  0x43   :  { %1629 = vmatprep.mubr.bf16.mxu0 %v1676_v3  ;;  %1637 = vmatprep.mubr.bf16.mxu1 %v1677_v4 }
  0x4a   :  { %1630 = vmatmul.mubr.bf16.gmra.mrb[4].mxu0 %v1678_v5  ;;  %1638 = vmatmul.mubr.bf16.gmra.mrb[4].mxu1 %v1679_v6 }
  0x84   :  { %v92_v46 = vpop.permute.xlu1 %91 }
  0x85   :  { %vm536_vm5 = vcmp.eq.s32.totalorder %v92_v46, %v1576_v49 }
  0x86   :  { %vm552_vm6 = vmand %vm1788_vm3, %vm536_vm5 }
  0x87   :  { %v1577_v61 = vsel %vm552_vm6, 1.0, %v1725_v60 }
  0x88   :  { %v95_v54 = vpop.permute.xlu1 %94 }
  0x89   :  { %vm537_vm7 = vcmp.eq.s32.totalorder %v95_v54, %v1576_v49 }
  0x8a   :  { %vm553_vm8 = vmand %vm1794_vm4, %vm537_vm7 }
  0x8b   :  { %v1578_v62 = vsel %vm553_vm8, 1.0, %v1725_v60 }
 0x115   :  { %v1627_v17 = vpop.f32.mrb[0].mxu0 }
 0x116   :  { %v380_v18 = vpop.f32.mrb[1].mxu0 }
 0x117   :  { %v443_v19 = vmul.f32 16.666666, %v380_v18  ;;  %v1628_v20 = vpop.f32.mrb[2].mxu0 }
 0x118   :  { %v383_v22 = vpop.f32.mrb[3].mxu0 }
 0x119   :  { %v600_v23 = vsel %vm1788_vm3, %v443_v19, -10000.0  ;;  %v444_v24 = vmul.f32 16.666666, %v383_v22  ;;  %v632_v63 = vmul.f32 %v1577_v61, %v443_v19 }
 0x11a   :  { %v616_v25 = vmax.f32 %v600_v23, -10000.0 }
 0x11b   :  { %v601_v27 = vsel %vm1794_vm4, %v444_v24, -10000.0  ;;  %v633_v0 = vmul.f32 %v1578_v62, %v444_v24 }
 0x11c   :  { %v696_v28 = vmax.f32 %v616_v25, -10000.0  ;;  %v617_v29 = vmax.f32 %v601_v27, -10000.0 }
 0x11e   :  { %1019 = vmax.xlane.f32.xlu0 %v696_v28  ;;  %v697_v30 = vmax.f32 %v617_v29, -10000.0  ;;  %v776_v31 = vsub.f32 -10000.0, %v696_v28  ;;  %v712_v34 = vsub.f32 %v600_v23, %v696_v28 }
 0x120   :  { %v792_v32 = vmul.f32 1.442695, %v776_v31  ;;  %v777_v33 = vsub.f32 -10000.0, %v697_v30  ;;  %v728_v36 = vmul.f32 1.442695, %v712_v34  ;;  %v713_v37 = vsub.f32 %v601_v27, %v697_v30 }
 0x122   :  { %1021 = vmax.xlane.f32.xlu0 %v697_v30  ;;  %1680 = vpow2.f32 %v792_v32  ;;  %v794_v35 = vmul.f32 1.442695, %v777_v33  ;;  %v730_v40 = vmul.f32 1.442695, %v713_v37 }
 0x124   :  { %1682 = vpow2.f32 %v794_v35 }
 0x125   :  { %1684 = vpow2.f32 %v728_v36  ;;  %v1635_v36 = vpop.f32.mrb[0].mxu1 }
 0x126   :  { %v412_v37 = vpop.f32.mrb[1].mxu1 }
 0x12c   :  { %v1681_v44 = vpop.eup %1680 }
 0x12d   :  { %v840_v47 = vmul.f32 0.0, %v1681_v44 }
 0x12e   :  { %v1683_v48 = vpop.eup %1682 }
 0x12f   :  { %v1685_v50 = vpop.eup %1684  ;;  %v841_v52 = vmul.f32 0.0, %v1683_v48 }
 0x130   :  { %v856_v51 = vadd.f32 %v1685_v50, %v840_v47 }
 0x1ab   :  { %v1800_v38 = vpop.xlane.xlu0 %1019 }
 0x1ac   :  { %v1067_v39 = vsub.f32 %v696_v28, %v1800_v38 }
 0x1ae   :  { %v1083_v41 = vmul.f32 1.442695, %v1067_v39 }
 0x1af   :  { %v1803_v42 = vpop.xlane.xlu0 %1021 }
 0x1b0   :  { %1686 = vpow2.f32 %v1083_v41  ;;  %v1068_v43 = vsub.f32 %v697_v30, %v1803_v42 }
 0x1b1   :  { %1688 = vpow2.f32 %v730_v40  ;;  %v1631_v40 = vpop.f32.mrb[4].mxu0 }
 0x1b2   :  { %v1085_v45 = vmul.f32 1.442695, %v1068_v43 }
 0x1b4   :  { %1690 = vpow2.f32 %v1085_v45 }
 0x1ba   :  { %v1687_v53 = vpop.eup %1686 }
 0x1bb   :  { %v1115_v55 = vmul.f32 %v1687_v53, %v856_v51  ;;  %v1689_v56 = vpop.eup %1688 }
 0x1bc   :  { %v857_v57 = vadd.f32 %v1689_v56, %v841_v52 }
 0x1bd   :  { %1131 = vadd.xlane.f32.xlu0 %v1115_v55 }
 0x1be   :  { %v1691_v58 = vpop.eup %1690 }
 0x1bf   :  { %v1116_v59 = vmul.f32 %v1691_v58, %v857_v57 }
 0x1c1   :  { %1227 = vadd.xlane.f32.xlu0 %v1577_v61  ;;  %1133 = vadd.xlane.f32.xlu1 %v1116_v59 }
 0x1c5   :  { %1229 = vadd.xlane.f32.xlu0 %v1578_v62 }
 0x1c9   :  { %1179 = vadd.xlane.f32.xlu0 %v632_v63 }
 0x1cd   :  { %1181 = vadd.xlane.f32.xlu0 %v633_v0 }
 0x24a   :  { %v1132_v7 = vpop.xlane.xlu0 %1131 }
 0x24b   :  { %1692 = vlog2.f32 %v1132_v7 }
 0x24e   :  { %v1228_v8 = vpop.xlane.xlu0 %1227  ;;  %v1134_v9 = vpop.xlane.xlu1 %1133 }
 0x24f   :  { %v1339_v10 = vmax.f32 %v1228_v8, 1.0  ;;  %1694 = vlog2.f32 %v1134_v9  ;;  %vm1438_vm9 = vcmp.gt.f32.partialorder %v1228_v8, 0.0 }
 0x251   :  { %1696 = vrcp.f32 %v1339_v10 }
 0x252   :  { %v1230_v11 = vpop.xlane.xlu0 %1229 }
 0x253   :  { %v1340_v12 = vmax.f32 %v1230_v11, 1.0  ;;  %vm1439_vm11 = vcmp.gt.f32.partialorder %v1230_v11, 0.0 }
 0x255   :  { %v1693_v13 = vpop.eup %1692  ;;  %1698 = vrcp.f32 %v1340_v12 }
 0x256   :  { %v1260_v14 = vmul.f32 0.6931472, %v1693_v13  ;;  %v1180_v17 = vpop.xlane.xlu0 %1179 }
 0x258   :  { %v1291_v15 = vadd.f32 %v1260_v14, %v1800_v38  ;;  %v1636_v38 = vpop.f32.mrb[2].mxu1 }
 0x259   :  { %v1695_v16 = vpop.eup %1694  ;;  %v415_v39 = vpop.f32.mrb[3].mxu1 }
 0x25a   :  { %v1262_v18 = vmul.f32 0.6931472, %v1695_v16  ;;  %v1307_v19 = vmul.f32 %v1291_v15, %v1228_v8  ;;  %v1182_v25 = vpop.xlane.xlu0 %1181  ;;  %v1639_v41 = vpop.f32.mrb[4].mxu1 }
 0x25b   :  { %v1697_v20 = vpop.eup %1696  ;;  %v428_v43 = vpop.f32.mrb[5].mxu1 }
 0x25c   :  { %v1323_v21 = vsub.f32 %v1180_v17, %v1307_v19  ;;  %v1292_v22 = vadd.f32 %v1262_v18, %v1803_v42  ;;  %v396_v42 = vpop.f32.mrb[5].mxu0  ;;  %v1640_v45 = vpop.f32.mrb[6].mxu1 }
 0x25d   :  { %v1632_v44 = vpop.f32.mrb[6].mxu0  ;;  %v431_v47 = vpop.f32.mrb[7].mxu1 }
 0x25e   :  { %v1356_v23 = vmul.f32 %v1697_v20, %v1323_v21  ;;  %v1308_v24 = vmul.f32 %v1292_v22, %v1230_v11  ;;  %v399_v46 = vpop.f32.mrb[7].mxu0 }
 0x25f   :  { %v1699_v28 = vpop.eup %1698 }
 0x260   :  { %v1470_v26 = vsub.f32 0.0, %v1356_v23  ;;  %v1324_v27 = vsub.f32 %v1182_v25, %v1308_v24 }
 0x262   :  { %v1358_v29 = vmul.f32 %v1699_v28, %v1324_v27  ;;  %v1486_v31 = vsel %vm1438_vm9, %v1470_v26, 0.0 }
 0x263   :  { %v1503_v33 = vsel %vm1502_vm10, %v1486_v31, 0.0 }
 0x264   :  { %v1471_v30 = vsub.f32 0.0, %v1358_v29 }
 0x266   :  { %v1487_v32 = vsel %vm1439_vm11, %v1471_v30, 0.0 }
 0x267   :  { %v1504_v34 = vsel %vm1502_vm10, %v1487_v32, 0.0 }
 0x268   :  { %v1505_v35 = vadd.f32 %v1504_v34, %v1503_v33 }
 0x26a   :  { %1534 = vadd.xlane.f32.xlu0 %v1505_v35 }
 0x2f7   :  { %v1535_v48 = vpop.xlane.xlu0 %1534 }
 0x2f8   :  { %v1536_v49 = vrot.slane %v1535_v48, 4 }
 0x2fa   :  { %v1537_v50 = vadd.f32 %v1536_v49, %v1535_v48 }
 0x2fc   :  { %v1538_v51 = vrot.slane %v1537_v50, 2 }
 0x2fe   :  { %v1539_v52 = vadd.f32 %v1538_v51, %v1537_v50 }
 0x300   :  { %v1540_v53 = vrot.slane %v1539_v52, 1 }
 0x302   :  { %v1541_v54 = vadd.f32 %v1540_v53, %v1539_v52 }
 0x304   :  { %1657 = vpush %v1541_v54 }
 0x335   :  { %s1658_s25 = spop %1657 }
 0x336   :  { %v1543_v55 = vstv %s1658_s25 }
 0x337   :  { %1545 = vst [vmem:[#allocation8] sm:$0x1] %v1543_v55 }
 0x338   :  { %1711 = shalt.err (!%p1708_p4)
}
 0x339   :  { %s1712_s30 = scalar_lea.hbm %s1849_s4, 16 }
 0x33a   :  { %p1713_p5 = scmp.ne.s32.totalorder %s1849_s4, %s1712_s30  ;;  %p1716_p6 = scmp.lt.u32.totalorder %s1712_s30, %s1849_s4 }
 0x33c   :  { %p1718_p7 = pnand %p1716_p6, %p1713_p5 }
 0x33e   :  { %1721 = shalt.err (!%p1718_p7)
}
 0x33f   :  { %1555 = dma.vmem_to_hbm [thread:$0]  %s1553_s24, 16, %s1849_s4, [#allocation9]  }
 0x340   :  { %1722 = dma.done.wait [#allocation9], 16  }
 0x341   :  { %1723 = vsyncadd [#allocation9], 4294967280 }
 0x342   :  { %1559 = vsyncpa [#allocation9], 1 }

</bundles_post_ra>
